<compile_context>
chip_gen: v7x
topology: tpu7x:2x2x1
jax: 0.10.0
libtpu: 0.0.40
codegen_flags: <defaults>
</compile_context>

<pallas_src>
import functools
import math

import jax
import jax.numpy as jnp
from jax.experimental import pallas as pl
from jax.experimental.pallas import tpu as pltpu


def _mha_kernel(x_ref, wqkv_ref, wproj_ref, bproj_ref, o_ref, *, B, T, C, nh, H):
    # x_ref:     (B*T, C)        batch folded into the matmul M dimension
    # wqkv_ref:  (C, 3*nh*H)     fused [q heads | k heads | v heads]
    # wproj_ref: (nh*H, C)       output projection weight
    # bproj_ref: (1, C)          output projection bias
    # o_ref:     (B*T, C)
    D = nh * H

    # One fused projection matmul for all heads and q/k/v (f32 accumulation).
    qkv = jnp.dot(x_ref[...], wqkv_ref[...],
                  preferred_element_type=jnp.float32)          # (B*T, 3*D)

    # Load the output projection weight and bias once (hoisted out of loops).
    wproj = wproj_ref[...]                                     # (D, C)
    bias = bproj_ref[...].astype(jnp.float32)                  # (1, C)

    # PyTorch module scales by n_embd**0.5 (C), NOT head_size -- reproduce it.
    scale = jnp.float32(1.0 / math.sqrt(C))

    # Causal mask, shared by all (batch, head) pairs.
    row = jax.lax.broadcasted_iota(jnp.int32, (T, T), 0)
    col = jax.lax.broadcasted_iota(jnp.int32, (T, T), 1)
    causal = row >= col
    neg = jnp.float32(-1e30)   # large finite negative: exp underflows to 0

    # B and nh are tiny -> statically unrolled loops lower to plain 2-D matmuls
    # that Mosaic handles cleanly; no concatenates, no dynamic indexing.
    for b in range(B):
        r0 = b * T
        out_b = jnp.broadcast_to(bias, (T, C))                 # start from bias
        for h in range(nh):
            c0 = h * H
            q = qkv[r0:r0 + T, c0:c0 + H]                      # (T, H)
            k = qkv[r0:r0 + T, D + c0:D + c0 + H]              # (T, H)
            v = qkv[r0:r0 + T, 2 * D + c0:2 * D + c0 + H]      # (T, H)

            # q @ k^T without an explicit transpose (contract over H).
            s = jax.lax.dot_general(
                q, k, (((1,), (1,)), ((), ())),
                preferred_element_type=jnp.float32) * scale    # (T, T)
            s = jnp.where(causal, s, neg)

            # softmax over the last dim (numerically-stable)
            m = jnp.max(s, axis=-1, keepdims=True)
            p = jnp.exp(s - m)
            denom = jnp.sum(p, axis=-1, keepdims=True)
            wei = p * pl.reciprocal(denom, approx=False)

            head_out = jnp.dot(wei, v,
                               preferred_element_type=jnp.float32)      # (T, H)

            # Fold the output projection per head: out += head_out @ Wp[rows_h]
            # (equivalent to concat(heads) @ Wp, but with zero concatenates).
            out_b = out_b + jnp.dot(head_out, wproj[c0:c0 + H, :],
                                    preferred_element_type=jnp.float32)  # (T, C)

        # Dropout is identity in eval/inference mode.
        # TODO(synk): training-mode dropout (pltpu.prng_* based) not implemented.
        o_ref[r0:r0 + T, :] = out_b.astype(o_ref.dtype)


@jax.jit
def multi_head_attention(x, w_q, w_k, w_v, w_proj, b_proj):
    """MultiHeadedAttention forward (eval mode).

    x:       (B, T, C)
    w_q/k/v: (nh, C, H)  per-head projection weights (kernel computes x @ W)
    w_proj:  (nh*H, C)   output projection weight (transposed nn.Linear weight)
    b_proj:  (C,)        output projection bias
    """
    B, T, C = x.shape
    nh, _, H = w_q.shape
    D = nh * H

    def fuse(w):  # (nh, C, H) -> (C, nh*H), head-major along the last dim
        return jnp.transpose(w, (1, 0, 2)).reshape(C, D)

    w_qkv = jnp.concatenate([fuse(w_q), fuse(w_k), fuse(w_v)], axis=-1)  # (C, 3D)
    x2d = x.reshape(B * T, C)
    b2d = b_proj.reshape(1, C)

    kernel = functools.partial(_mha_kernel, B=B, T=T, C=C, nh=nh, H=H)

    out2d = pl.pallas_call(
        kernel,
        out_shape=jax.ShapeDtypeStruct((B * T, C), x.dtype),
        in_specs=[
            pl.BlockSpec(memory_space=pltpu.MemorySpace.VMEM),  # x2d
            pl.BlockSpec(memory_space=pltpu.MemorySpace.VMEM),  # w_qkv
            pl.BlockSpec(memory_space=pltpu.MemorySpace.VMEM),  # w_proj
            pl.BlockSpec(memory_space=pltpu.MemorySpace.VMEM),  # b_proj
        ],
        out_specs=pl.BlockSpec(memory_space=pltpu.MemorySpace.VMEM),
    )(x2d, w_qkv, w_proj, b2d)

    return out2d.reshape(B, T, C)


def multi_head_attention_ref(x, w_q, w_k, w_v, w_proj, b_proj):
    """Pure-JAX reference matching the PyTorch MultiHeadedAttention forward (eval)."""
    B, T, C = x.shape
    nh = w_q.shape[0]
    tril = jnp.tril(jnp.ones((T, T)))
    outs = []
    for h in range(nh):
        k = x @ w_k[h]
        q = x @ w_q[h]
        v = x @ w_v[h]
        wei = (q @ jnp.swapaxes(k, 1, 2)) / math.sqrt(C)
        wei = jnp.where(tril == 0, -jnp.inf, wei)
        wei = jax.nn.softmax(wei, axis=-1)
        outs.append(wei @ v)
    out = jnp.concatenate(outs, axis=-1)          # (B, T, nh*H)
    out = out @ w_proj + b_proj                   # nn.Linear(n_embd, n_embd)
    return out                                    # dropout = identity in eval


if __name__ == "__main__":
    # Small shapes consistent with the module:
    # B=2, T=block_size=8, C=n_embd=32, num_heads=2, head_size=16 (nh*H == C).
    B, T, C, NH, H = 2, 8, 32, 2, 16

    key = jax.random.PRNGKey(0)
    kx, kq, kk, kv, kp, kb = jax.random.split(key, 6)

    x = jax.random.normal(kx, (B, T, C), dtype=jnp.float32)
    w_q = jax.random.normal(kq, (NH, C, H), dtype=jnp.float32) * 0.1
    w_k = jax.random.normal(kk, (NH, C, H), dtype=jnp.float32) * 0.1
    w_v = jax.random.normal(kv, (NH, C, H), dtype=jnp.float32) * 0.1
    w_proj = jax.random.normal(kp, (NH * H, C), dtype=jnp.float32) * 0.1
    b_proj = jax.random.normal(kb, (C,), dtype=jnp.float32) * 0.1

    out = multi_head_attention(x, w_q, w_k, w_v, w_proj, b_proj)
    out = jax.block_until_ready(out)

    ref = multi_head_attention_ref(x, w_q, w_k, w_v, w_proj, b_proj)
    assert out.shape == (B, T, C)
    assert jnp.allclose(out, ref, atol=1e-4, rtol=1e-4), "mismatch vs reference"

    print("KERNEL_OK")
</pallas_src>

<mosaic_0001>
module attributes {stable_mosaic.version = 11 : i64} {
  func.func @_mha_kernel(%arg0: memref<16x32xf32, #tpu.memory_space<vmem>>, %arg1: memref<32x96xf32, #tpu.memory_space<vmem>>, %arg2: memref<32x32xf32, #tpu.memory_space<vmem>>, %arg3: memref<1x32xf32, #tpu.memory_space<vmem>>, %arg4: memref<16x32xf32, #tpu.memory_space<vmem>>) attributes {dimension_semantics = [], scalar_prefetch = 0 : i64, scratch_operands = 0 : i64, tpu.core_type = #tpu.core_type<tc>} {
    %c0 = arith.constant 0 : index
    %c0_0 = arith.constant 0 : index
    %0 = vector.load %arg0[%c0, %c0_0] : memref<16x32xf32, #tpu.memory_space<vmem>>, vector<16x32xf32>
    %c0_1 = arith.constant 0 : index
    %c0_2 = arith.constant 0 : index
    %1 = vector.load %arg1[%c0_1, %c0_2] : memref<32x96xf32, #tpu.memory_space<vmem>>, vector<32x96xf32>
    %cst = arith.constant dense<0.000000e+00> : vector<16x96xf32>
    %2 = tpu.matmul %0, %1, %cst {dimension_numbers = #tpu.dot_dimension_numbers<[1], [0], [0], [1], [0, 0, 1, 1], [], []>} : vector<16x32xf32>, vector<32x96xf32>, vector<16x96xf32> -> vector<16x96xf32>
    %c0_3 = arith.constant 0 : index
    %c0_4 = arith.constant 0 : index
    %3 = vector.load %arg2[%c0_3, %c0_4] : memref<32x32xf32, #tpu.memory_space<vmem>>, vector<32x32xf32>
    %c0_5 = arith.constant 0 : index
    %c0_6 = arith.constant 0 : index
    %4 = vector.load %arg3[%c0_5, %c0_6] : memref<1x32xf32, #tpu.memory_space<vmem>>, vector<1x32xf32>
    %5 = tpu.iota {dimensions = array<i32: 0>} : vector<8x8xi32>
    %6 = tpu.iota {dimensions = array<i32: 1>} : vector<8x8xi32>
    %7 = arith.cmpi sge, %5, %6 : vector<8x8xi32>
    %8 = vector.shape_cast %4 : vector<1x32xf32> to vector<1x32xf32>
    %9 = vector.broadcast %8 : vector<1x32xf32> to vector<8x32xf32>
    %10 = vector.extract_strided_slice %2 {offsets = [0, 0], sizes = [8, 16], strides = [1, 1]} : vector<16x96xf32> to vector<8x16xf32>
    %11 = vector.extract_strided_slice %2 {offsets = [0, 32], sizes = [8, 16], strides = [1, 1]} : vector<16x96xf32> to vector<8x16xf32>
    %12 = vector.extract_strided_slice %2 {offsets = [0, 64], sizes = [8, 16], strides = [1, 1]} : vector<16x96xf32> to vector<8x16xf32>
    %cst_7 = arith.constant dense<0.000000e+00> : vector<8x8xf32>
    %13 = tpu.matmul %10, %11, %cst_7 {dimension_numbers = #tpu.dot_dimension_numbers<[1], [1], [0], [0], [0, 0, 1, 0], [], []>} : vector<8x16xf32>, vector<8x16xf32>, vector<8x8xf32> -> vector<8x8xf32>
    %cst_8 = arith.constant 0.176776692 : f32
    %14 = vector.broadcast %cst_8 : f32 to vector<8x8xf32>
    %15 = arith.mulf %13, %14 : vector<8x8xf32>
    %cst_9 = arith.constant -1.000000e+30 : f32
    %16 = vector.broadcast %cst_9 : f32 to vector<8x8xf32>
    %17 = arith.select %7, %15, %16 : vector<8x8xi1>, vector<8x8xf32>
    %cst_10 = arith.constant dense<0xFF800000> : vector<8xf32>
    %18 = vector.multi_reduction <maximumf>, %17, %cst_10 [1] : vector<8x8xf32> to vector<8xf32>
    %19 = vector.shape_cast %18 : vector<8xf32> to vector<8x1xf32>
    %20 = vector.broadcast %19 : vector<8x1xf32> to vector<8x8xf32>
    %21 = arith.subf %17, %20 : vector<8x8xf32>
    %22 = math.exp %21 : vector<8x8xf32>
    %cst_11 = arith.constant dense<0.000000e+00> : vector<8xf32>
    %23 = vector.multi_reduction <add>, %22, %cst_11 [1] : vector<8x8xf32> to vector<8xf32>
    %24 = vector.shape_cast %23 : vector<8xf32> to vector<8x1xf32>
    %25 = tpu.reciprocal %24 : vector<8x1xf32> -> vector<8x1xf32>
    %26 = vector.broadcast %25 : vector<8x1xf32> to vector<8x8xf32>
    %27 = arith.mulf %22, %26 : vector<8x8xf32>
    %cst_12 = arith.constant dense<0.000000e+00> : vector<8x16xf32>
    %28 = tpu.matmul %27, %12, %cst_12 {dimension_numbers = #tpu.dot_dimension_numbers<[1], [0], [0], [1], [0, 0, 1, 1], [], []>} : vector<8x8xf32>, vector<8x16xf32>, vector<8x16xf32> -> vector<8x16xf32>
    %29 = vector.extract_strided_slice %3 {offsets = [0, 0], sizes = [16, 32], strides = [1, 1]} : vector<32x32xf32> to vector<16x32xf32>
    %cst_13 = arith.constant dense<0.000000e+00> : vector<8x32xf32>
    %30 = tpu.matmul %28, %29, %cst_13 {dimension_numbers = #tpu.dot_dimension_numbers<[1], [0], [0], [1], [0, 0, 1, 1], [], []>} : vector<8x16xf32>, vector<16x32xf32>, vector<8x32xf32> -> vector<8x32xf32>
    %31 = arith.addf %9, %30 : vector<8x32xf32>
    %32 = vector.extract_strided_slice %2 {offsets = [0, 16], sizes = [8, 16], strides = [1, 1]} : vector<16x96xf32> to vector<8x16xf32>
    %33 = vector.extract_strided_slice %2 {offsets = [0, 48], sizes = [8, 16], strides = [1, 1]} : vector<16x96xf32> to vector<8x16xf32>
    %34 = vector.extract_strided_slice %2 {offsets = [0, 80], sizes = [8, 16], strides = [1, 1]} : vector<16x96xf32> to vector<8x16xf32>
    %cst_14 = arith.constant dense<0.000000e+00> : vector<8x8xf32>
    %35 = tpu.matmul %32, %33, %cst_14 {dimension_numbers = #tpu.dot_dimension_numbers<[1], [1], [0], [0], [0, 0, 1, 0], [], []>} : vector<8x16xf32>, vector<8x16xf32>, vector<8x8xf32> -> vector<8x8xf32>
    %cst_15 = arith.constant 0.176776692 : f32
    %36 = vector.broadcast %cst_15 : f32 to vector<8x8xf32>
    %37 = arith.mulf %35, %36 : vector<8x8xf32>
    %cst_16 = arith.constant -1.000000e+30 : f32
    %38 = vector.broadcast %cst_16 : f32 to vector<8x8xf32>
    %39 = arith.select %7, %37, %38 : vector<8x8xi1>, vector<8x8xf32>
    %cst_17 = arith.constant dense<0xFF800000> : vector<8xf32>
    %40 = vector.multi_reduction <maximumf>, %39, %cst_17 [1] : vector<8x8xf32> to vector<8xf32>
    %41 = vector.shape_cast %40 : vector<8xf32> to vector<8x1xf32>
    %42 = vector.broadcast %41 : vector<8x1xf32> to vector<8x8xf32>
    %43 = arith.subf %39, %42 : vector<8x8xf32>
    %44 = math.exp %43 : vector<8x8xf32>
    %cst_18 = arith.constant dense<0.000000e+00> : vector<8xf32>
    %45 = vector.multi_reduction <add>, %44, %cst_18 [1] : vector<8x8xf32> to vector<8xf32>
    %46 = vector.shape_cast %45 : vector<8xf32> to vector<8x1xf32>
    %47 = tpu.reciprocal %46 : vector<8x1xf32> -> vector<8x1xf32>
    %48 = vector.broadcast %47 : vector<8x1xf32> to vector<8x8xf32>
    %49 = arith.mulf %44, %48 : vector<8x8xf32>
    %cst_19 = arith.constant dense<0.000000e+00> : vector<8x16xf32>
    %50 = tpu.matmul %49, %34, %cst_19 {dimension_numbers = #tpu.dot_dimension_numbers<[1], [0], [0], [1], [0, 0, 1, 1], [], []>} : vector<8x8xf32>, vector<8x16xf32>, vector<8x16xf32> -> vector<8x16xf32>
    %51 = vector.extract_strided_slice %3 {offsets = [16, 0], sizes = [16, 32], strides = [1, 1]} : vector<32x32xf32> to vector<16x32xf32>
    %cst_20 = arith.constant dense<0.000000e+00> : vector<8x32xf32>
    %52 = tpu.matmul %50, %51, %cst_20 {dimension_numbers = #tpu.dot_dimension_numbers<[1], [0], [0], [1], [0, 0, 1, 1], [], []>} : vector<8x16xf32>, vector<16x32xf32>, vector<8x32xf32> -> vector<8x32xf32>
    %53 = arith.addf %31, %52 : vector<8x32xf32>
    %c0_21 = arith.constant 0 : index
    %c0_22 = arith.constant 0 : index
    %54 = vector.load %arg4[%c0_21, %c0_22] : memref<16x32xf32, #tpu.memory_space<vmem>>, vector<8x32xf32>
    tpu.vector_store %arg4[%c0_21, %c0_22], %53 {strides = array<i32>} : memref<16x32xf32, #tpu.memory_space<vmem>>, vector<8x32xf32>,
    %55 = vector.shape_cast %4 : vector<1x32xf32> to vector<1x32xf32>
    %56 = vector.broadcast %55 : vector<1x32xf32> to vector<8x32xf32>
    %57 = vector.extract_strided_slice %2 {offsets = [8, 0], sizes = [8, 16], strides = [1, 1]} : vector<16x96xf32> to vector<8x16xf32>
    %58 = vector.extract_strided_slice %2 {offsets = [8, 32], sizes = [8, 16], strides = [1, 1]} : vector<16x96xf32> to vector<8x16xf32>
    %59 = vector.extract_strided_slice %2 {offsets = [8, 64], sizes = [8, 16], strides = [1, 1]} : vector<16x96xf32> to vector<8x16xf32>
    %cst_23 = arith.constant dense<0.000000e+00> : vector<8x8xf32>
    %60 = tpu.matmul %57, %58, %cst_23 {dimension_numbers = #tpu.dot_dimension_numbers<[1], [1], [0], [0], [0, 0, 1, 0], [], []>} : vector<8x16xf32>, vector<8x16xf32>, vector<8x8xf32> -> vector<8x8xf32>
    %cst_24 = arith.constant 0.176776692 : f32
    %61 = vector.broadcast %cst_24 : f32 to vector<8x8xf32>
    %62 = arith.mulf %60, %61 : vector<8x8xf32>
    %cst_25 = arith.constant -1.000000e+30 : f32
    %63 = vector.broadcast %cst_25 : f32 to vector<8x8xf32>
    %64 = arith.select %7, %62, %63 : vector<8x8xi1>, vector<8x8xf32>
    %cst_26 = arith.constant dense<0xFF800000> : vector<8xf32>
    %65 = vector.multi_reduction <maximumf>, %64, %cst_26 [1] : vector<8x8xf32> to vector<8xf32>
    %66 = vector.shape_cast %65 : vector<8xf32> to vector<8x1xf32>
    %67 = vector.broadcast %66 : vector<8x1xf32> to vector<8x8xf32>
    %68 = arith.subf %64, %67 : vector<8x8xf32>
    %69 = math.exp %68 : vector<8x8xf32>
    %cst_27 = arith.constant dense<0.000000e+00> : vector<8xf32>
    %70 = vector.multi_reduction <add>, %69, %cst_27 [1] : vector<8x8xf32> to vector<8xf32>
    %71 = vector.shape_cast %70 : vector<8xf32> to vector<8x1xf32>
    %72 = tpu.reciprocal %71 : vector<8x1xf32> -> vector<8x1xf32>
    %73 = vector.broadcast %72 : vector<8x1xf32> to vector<8x8xf32>
    %74 = arith.mulf %69, %73 : vector<8x8xf32>
    %cst_28 = arith.constant dense<0.000000e+00> : vector<8x16xf32>
    %75 = tpu.matmul %74, %59, %cst_28 {dimension_numbers = #tpu.dot_dimension_numbers<[1], [0], [0], [1], [0, 0, 1, 1], [], []>} : vector<8x8xf32>, vector<8x16xf32>, vector<8x16xf32> -> vector<8x16xf32>
    %76 = vector.extract_strided_slice %3 {offsets = [0, 0], sizes = [16, 32], strides = [1, 1]} : vector<32x32xf32> to vector<16x32xf32>
    %cst_29 = arith.constant dense<0.000000e+00> : vector<8x32xf32>
    %77 = tpu.matmul %75, %76, %cst_29 {dimension_numbers = #tpu.dot_dimension_numbers<[1], [0], [0], [1], [0, 0, 1, 1], [], []>} : vector<8x16xf32>, vector<16x32xf32>, vector<8x32xf32> -> vector<8x32xf32>
    %78 = arith.addf %56, %77 : vector<8x32xf32>
    %79 = vector.extract_strided_slice %2 {offsets = [8, 16], sizes = [8, 16], strides = [1, 1]} : vector<16x96xf32> to vector<8x16xf32>
    %80 = vector.extract_strided_slice %2 {offsets = [8, 48], sizes = [8, 16], strides = [1, 1]} : vector<16x96xf32> to vector<8x16xf32>
    %81 = vector.extract_strided_slice %2 {offsets = [8, 80], sizes = [8, 16], strides = [1, 1]} : vector<16x96xf32> to vector<8x16xf32>
    %cst_30 = arith.constant dense<0.000000e+00> : vector<8x8xf32>
    %82 = tpu.matmul %79, %80, %cst_30 {dimension_numbers = #tpu.dot_dimension_numbers<[1], [1], [0], [0], [0, 0, 1, 0], [], []>} : vector<8x16xf32>, vector<8x16xf32>, vector<8x8xf32> -> vector<8x8xf32>
    %cst_31 = arith.constant 0.176776692 : f32
    %83 = vector.broadcast %cst_31 : f32 to vector<8x8xf32>
    %84 = arith.mulf %82, %83 : vector<8x8xf32>
    %cst_32 = arith.constant -1.000000e+30 : f32
    %85 = vector.broadcast %cst_32 : f32 to vector<8x8xf32>
    %86 = arith.select %7, %84, %85 : vector<8x8xi1>, vector<8x8xf32>
    %cst_33 = arith.constant dense<0xFF800000> : vector<8xf32>
    %87 = vector.multi_reduction <maximumf>, %86, %cst_33 [1] : vector<8x8xf32> to vector<8xf32>
    %88 = vector.shape_cast %87 : vector<8xf32> to vector<8x1xf32>
    %89 = vector.broadcast %88 : vector<8x1xf32> to vector<8x8xf32>
    %90 = arith.subf %86, %89 : vector<8x8xf32>
    %91 = math.exp %90 : vector<8x8xf32>
    %cst_34 = arith.constant dense<0.000000e+00> : vector<8xf32>
    %92 = vector.multi_reduction <add>, %91, %cst_34 [1] : vector<8x8xf32> to vector<8xf32>
    %93 = vector.shape_cast %92 : vector<8xf32> to vector<8x1xf32>
    %94 = tpu.reciprocal %93 : vector<8x1xf32> -> vector<8x1xf32>
    %95 = vector.broadcast %94 : vector<8x1xf32> to vector<8x8xf32>
    %96 = arith.mulf %91, %95 : vector<8x8xf32>
    %cst_35 = arith.constant dense<0.000000e+00> : vector<8x16xf32>
    %97 = tpu.matmul %96, %81, %cst_35 {dimension_numbers = #tpu.dot_dimension_numbers<[1], [0], [0], [1], [0, 0, 1, 1], [], []>} : vector<8x8xf32>, vector<8x16xf32>, vector<8x16xf32> -> vector<8x16xf32>
    %98 = vector.extract_strided_slice %3 {offsets = [16, 0], sizes = [16, 32], strides = [1, 1]} : vector<32x32xf32> to vector<16x32xf32>
    %cst_36 = arith.constant dense<0.000000e+00> : vector<8x32xf32>
    %99 = tpu.matmul %97, %98, %cst_36 {dimension_numbers = #tpu.dot_dimension_numbers<[1], [0], [0], [1], [0, 0, 1, 1], [], []>} : vector<8x16xf32>, vector<16x32xf32>, vector<8x32xf32> -> vector<8x32xf32>
    %100 = arith.addf %78, %99 : vector<8x32xf32>
    %c8 = arith.constant 8 : index
    %c0_37 = arith.constant 0 : index
    %101 = vector.load %arg4[%c8, %c0_37] : memref<16x32xf32, #tpu.memory_space<vmem>>, vector<8x32xf32>
    tpu.vector_store %arg4[%c8, %c0_37], %100 {strides = array<i32>} : memref<16x32xf32, #tpu.memory_space<vmem>>, vector<8x32xf32>,
    return
  }
}

</mosaic_0001>

<bundles_post_ra>
// kernel: multi_head_attention.1
= control target key start
LH: loop header
LB: loop body
LE: loop exit
PB: predicated region body
PF: predicated region fallthrough
CT: control target
= control target key end

     0   :  { %vm24_vm0 = vcmask 261120   ;;  %s1504_s0 = inlined_call_operand.vmem [shape: f32[16,32], index: 0, kind: input, shape index: {}]   ;;  %s1505_s1 = inlined_call_operand.vmem [shape: f32[32,96], index: 1, kind: input, shape index: {}]   ;;  %s1506_s2 = inlined_call_operand.vmem [shape: f32[32,32], index: 2, kind: input, shape index: {}]   ;;  %s1507_s3 = inlined_call_operand.vmem [shape: f32[1,32], index: 3, kind: input, shape index: {}]   ;;  %s1508_s4 = inlined_call_operand.hbm [shape: f32[16,32], index: 4, kind: output, shape index: {}]  }
   0x1   :  { %v20_v0 = vld [vmem:[%s1505_s1] sm:$0xff]  ;;  %v21_v1 = vld [vmem:[%s1505_s1 + $0x8] sm:$0xff]  ;;  %v22_v2 = vld [vmem:[%s1505_s1 + $0x10] sm:$0xff] }
   0x2   :  { %v1236_v3 = vpack.c.bf16 %v21_v1, %v20_v0  ;;  %v23_v4 = vld [vmem:[%s1505_s1 + $0x18] sm:$0xff]  ;;  %v18_v5 = vld [vmem:[%s1504_s0] sm:$0xff] }
   0x3   :  { %v1240_v6 = vpack.c.bf16 %v23_v4, %v22_v2  ;;  %1165 = vmatprep.mubr.msk.f32.mxu0 %vm24_vm0, %v18_v5 }
   0x4   :  { %9 = vsyncpa [#allocation3], 0  ;;  %1237 = vmatprep.subr.bf16.mxu0 %v1236_v3  ;;  %v19_v7 = vld [vmem:[%s1504_s0 + $0x8] sm:$0xff]  ;;  %v1312_v8 = vmov 0.0   ;;  %vm1313_vm1 = vmmov 0   ;;  %s1314_s1 = smov 96   ;;  %v111_v12 = vlaneseq }
   0x5   :  { %1239 = vmatpush3.bf16.msra.mxu0 %v1236_v3  ;;  %1168 = vmatprep.subr.mxu1 %v1312_v8  ;;  %vm125_vm2 = vcmask 130048   ;;  %vm202_vm4 = vcmask 64512   ;;  %s1315_s0 = smov 64   ;;  %s1316_s27 = smov 80   ;;  %v1318_v27 = vmov 0.0|0.0   ;;  %v106_v28 = vld [vmem:[%s1506_s2] sm:$0xff] }
   0x6   :  { %1241 = vmatprep.subr.bf16.mxu0 %v1240_v6  ;;  %1170 = vmatprep.mubr.msk.f32.mxu1 %vm1313_vm1, %v1312_v8  ;;  %v1386_v13 = vshrl.u32 %v111_v12, 7  ;;  %v1388_v14 = vand.u32 127, %v111_v12  ;;  %s1317_s28 = smov 112   ;;  %v107_v29 = vld [vmem:[%s1506_s2 + $0x8] sm:$0xff]  ;;  %s1319_s7 = smov 48  }
   0x7   :  { %v1412_v31 = vpack.c.bf16 %v107_v29, %v106_v28  ;;  %v1106_v29 = vld [vmem:[%s1507_s3] ss:$0 sm:$0xff]  ;;  %s1320_s13 = smov [#allocation2]  }
   0x8   :  { %vm115_vm3 = vcmp.ge.s32.totalorder %v1386_v13, %v1388_v14  ;;  %s1093_s14 = sshll.u32 %s1320_s13, 4  ;;  %s1094_s14 = int_to_ptr.vmem [resolvable:$true] %s1093_s14 }
   0x9   :  { %1243 = vmatpush3.bf16.msra.mxu0 %v1240_v6  ;;  %s1288_s3 = scalar_lea.vmem %s1094_s14, 256  ;;  %p1293_p1 = scmp.lt.s32.totalorder %s1094_s14, %s1094_s14 }
   0xa   :  { %1190 = vmatprep.subr.mxu0 %v1312_v8  ;;  %p1289_p0 = scmp.ne.s32.totalorder %s1094_s14, %s1288_s3  ;;  %p1294_p2 = scmp.lt.s32.totalorder %s1288_s3, %s1288_s3 }
   0xc   :  { %1166 = vmatmul.mubr.msk.f32.vlgmr.msra.gmra.mrb[0].mxu0 %vm24_vm0, %v19_v7  ;;  %p1295_p3 = por %p1294_p2, %p1293_p1 }
   0xd   :  { %1192 = vmatprep.mubr.msk.f32.mxu0 %vm1313_vm1, %v1312_v8 }
   0xe   :  { %p1296_p4 = pnand %p1295_p3, %p1289_p0 }
  0xdf   :  { %v1374_v9 = vpop.f32.mrb[0].mxu0 }
  0xe0   :  { %v1376_v10 = vpop.f32.mrb[1].mxu0 }
  0xe1   :  { %123 = vrot.lane.b32.xlu0 %v1376_v10, %s1314_s1 }
 0x153   :  { %v124_v11 = vpop.permute.xlu0 %123 }
 0x154   :  { %1169 = vmatpush3.xpose.msk.msra.mxu1 %vm125_vm2, %v124_v11 }
 0x155   :  { %1173 = vmatprep.subr.mxu1 %v1312_v8 }
 0x157   :  { %1171 = vmatmul.mubr.msk.f32.vlgmr.msra.gmra.mrb[0].mxu1 %vm125_vm2, %v1376_v10 }
 0x158   :  { %1175 = vmatprep.mubr.msk.f32.mxu1 %vm1313_vm1, %v1312_v8 }
 0x22a   :  { %v196_v15 = vpop.f32.mrb[0].mxu1 }
 0x22b   :  { %v200_v16 = vmul.f32 0.17677669, %v196_v15  ;;  %v1172_v17 = vpop.f32.mrb[1].mxu1 }
 0x22c   :  { %v108_v17 = vld [vmem:[%s1506_s2 + $0x10] sm:$0xff] }
 0x22d   :  { %v201_v18 = vsel %vm115_vm3, %v200_v16, -1e+30 }
 0x22e   :  { %v203_v19 = vsel %vm202_vm4, %v201_v18, -inf }
 0x22f   :  { %204 = vmax.xlane.f32.xlu0 %v203_v19 }
 0x245   :  { %696 = vrot.lane.b32.xlu0 %v1374_v9, %s1315_s0 }
 0x249   :  { %848 = vrot.lane.b32.xlu0 %v1374_v9, %s1316_s27 }
 0x2bc   :  { %v205_v20 = vpop.xlane.xlu0 %204 }
 0x2bd   :  { %v206_v21 = vsub.f32 %v201_v18, %v205_v20  ;;  %v109_v18 = vld [vmem:[%s1506_s2 + $0x18] sm:$0xff] }
 0x2be   :  { %v1248_v19 = vpack.c.bf16 %v109_v18, %v108_v17 }
 0x2bf   :  { %v207_v22 = vmul.f32 1.442695, %v206_v21 }
 0x2c0   :  { %v697_v38 = vpop.permute.xlu0 %696 }
 0x2c1   :  { %1272 = vpow2.f32 %v207_v22 }
 0x2c4   :  { %v849_v56 = vpop.permute.xlu0 %848 }
 0x2cb   :  { %v1273_v23 = vpop.eup %1272 }
 0x2cc   :  { %v209_v24 = vsel %vm202_vm4, %v1273_v23, 0.0 }
 0x2cd   :  { %210 = vadd.xlane.f32.xlu1 %v209_v24 }
 0x2de   :  { %214 = vrot.lane.b32.xlu1 %v1376_v10, %s1315_s0 }
 0x2e2   :  { %366 = vrot.lane.b32.xlu1 %v1376_v10, %s1316_s27 }
 0x2e6   :  { %364 = vrot.lane.b32.xlu1 %v1376_v10, %s1317_s28 }
 0x2ea   :  { %607 = vrot.lane.b32.xlu1 %v1374_v9, %s1314_s1 }
 0x35a   :  { %v211_v25 = vpop.xlane.xlu1 %210 }
 0x35b   :  { %1274 = vrcp.f32 %v211_v25 }
 0x35e   :  { %v215_v26 = vpop.permute.xlu1 %214 }
 0x35f   :  { %1174 = vmatpush3.msra.mxu1 %v215_v26 }
 0x360   :  { %1244 = vmatprep.subr.bf16.mxu1 %v1318_v27 }
 0x362   :  { %v367_v33 = vpop.permute.xlu1 %366 }
 0x365   :  { %v1275_v30 = vpop.eup %1274 }
 0x366   :  { %v213_v32 = vmul.f32 %v1275_v30, %v1273_v23  ;;  %v365_v34 = vpop.permute.xlu1 %364 }
 0x368   :  { %1176 = vmatmul.mubr.msk.f32.vlgmr.msra.gmra.mrb[2].mxu1 %vm202_vm4, %v213_v32 }
 0x369   :  { %1246 = vmatpush3.bf16.msra.mxu1 %v1412_v31  ;;  %1182 = vmatprep.mubr.msk.f32.mxu1 %vm1313_vm1, %v1312_v8 }
 0x36a   :  { %1185 = vmatprep.subr.mxu1 %v1312_v8  ;;  %v608_v37 = vpop.permute.xlu1 %607 }
 0x43b   :  { %v286_v35 = vpop.f32.mrb[2].mxu1 }
 0x43c   :  { %v1177_v36 = vpop.f32.mrb[3].mxu1  ;;  %1183 = vmatmul.mubr.msk.f32.vlgmr.msra.gmra.mrb[4].mxu1 %vm125_vm2, %v286_v35 }
 0x43d   :  { %1186 = vmatpush3.xpose.msk.msra.mxu1 %vm125_vm2, %v367_v33  ;;  %1187 = vmatprep.mubr.msk.f32.mxu1 %vm1313_vm1, %v1312_v8 }
 0x43e   :  { %1202 = vmatprep.subr.mxu1 %v1312_v8 }
 0x440   :  { %1188 = vmatmul.mubr.msk.f32.vlgmr.msra.gmra.mrb[6].mxu1 %vm125_vm2, %v365_v34 }
 0x441   :  { %1203 = vmatpush3.xpose.msk.msra.mxu1 %vm125_vm2, %v608_v37  ;;  %1204 = vmatprep.mubr.msk.f32.mxu1 %vm1313_vm1, %v1312_v8 }
 0x442   :  { %1207 = vmatprep.subr.mxu1 %v1312_v8 }
 0x444   :  { %1205 = vmatmul.mubr.msk.f32.vlgmr.msra.gmra.mrb[8].mxu1 %vm125_vm2, %v1374_v9 }
 0x445   :  { %1208 = vmatpush3.msra.mxu1 %v697_v38  ;;  %1209 = vmatprep.mubr.msk.f32.mxu1 %vm1313_vm1, %v1312_v8 }
 0x446   :  { %1219 = vmatprep.subr.mxu1 %v1312_v8 }
 0x50f   :  { %v1434_v39 = vpop.f32.mrb[4].mxu1 }
 0x510   :  { %v1184_v40 = vpop.f32.mrb[5].mxu1  ;;  %v363_v30 = vadd.f32 %v1106_v29, %v1434_v39 }
 0x513   :  { %v438_v41 = vpop.f32.mrb[6].mxu1 }
 0x514   :  { %v1189_v42 = vpop.f32.mrb[7].mxu1  ;;  %v442_v53 = vmul.f32 0.17677669, %v438_v41 }
 0x516   :  { %v443_v54 = vsel %vm115_vm3, %v442_v53, -1e+30 }
 0x517   :  { %v679_v43 = vpop.f32.mrb[8].mxu1  ;;  %v444_v55 = vsel %vm202_vm4, %v443_v54, -inf }
 0x518   :  { %v683_v44 = vmul.f32 0.17677669, %v679_v43  ;;  %v1206_v45 = vpop.f32.mrb[9].mxu1 }
 0x51a   :  { %v684_v46 = vsel %vm115_vm3, %v683_v44, -1e+30 }
 0x51b   :  { %v685_v47 = vsel %vm202_vm4, %v684_v46, -inf }
 0x51c   :  { %686 = vmax.xlane.f32.xlu1 %v685_v47 }
 0x5a9   :  { %v687_v48 = vpop.xlane.xlu1 %686 }
 0x5aa   :  { %v688_v49 = vsub.f32 %v684_v46, %v687_v48 }
 0x5ac   :  { %v689_v50 = vmul.f32 1.442695, %v688_v49 }
 0x5ae   :  { %1276 = vpow2.f32 %v689_v50 }
 0x5b8   :  { %v1277_v51 = vpop.eup %1276 }
 0x5b9   :  { %v691_v52 = vsel %vm202_vm4, %v1277_v51, 0.0 }
 0x5ba   :  { %692 = vadd.xlane.f32.xlu0 %v691_v52 }
 0x5d0   :  { %846 = vrot.lane.b32.xlu0 %v1374_v9, %s1317_s28 }
 0x5ef   :  { %445 = vmax.xlane.f32.xlu0 %v444_v55 }
 0x647   :  { %v693_v57 = vpop.xlane.xlu0 %692 }
 0x648   :  { %1278 = vrcp.f32 %v693_v57 }
 0x64b   :  { %v847_v60 = vpop.permute.xlu0 %846 }
 0x652   :  { %v1279_v58 = vpop.eup %1278 }
 0x653   :  { %v695_v59 = vmul.f32 %v1279_v58, %v1277_v51 }
 0x655   :  { %1210 = vmatmul.mubr.msk.f32.vlgmr.msra.gmra.mrb[10].mxu1 %vm202_vm4, %v695_v59 }
 0x656   :  { %1220 = vmatpush3.xpose.msk.msra.mxu1 %vm125_vm2, %v849_v56  ;;  %1221 = vmatprep.mubr.msk.f32.mxu1 %vm1313_vm1, %v1312_v8 }
 0x659   :  { %1222 = vmatmul.mubr.msk.f32.vlgmr.msra.gmra.mrb[12].mxu1 %vm125_vm2, %v847_v60 }
 0x67c   :  { %v446_v61 = vpop.xlane.xlu0 %445 }
 0x67d   :  { %v447_v62 = vsub.f32 %v443_v54, %v446_v61 }
 0x67f   :  { %v448_v63 = vmul.f32 1.442695, %v447_v62 }
 0x681   :  { %1280 = vpow2.f32 %v448_v63 }
 0x68b   :  { %v1281_v0 = vpop.eup %1280 }
 0x68c   :  { %v450_v1 = vsel %vm202_vm4, %v1281_v0, 0.0 }
 0x68d   :  { %451 = vadd.xlane.f32.xlu1 %v450_v1 }
 0x69e   :  { %455 = vrot.lane.b32.xlu1 %v1376_v10, %s1319_s7 }
 0x71a   :  { %v452_v2 = vpop.xlane.xlu1 %451 }
 0x71b   :  { %1282 = vrcp.f32 %v452_v2 }
 0x71e   :  { %v456_v3 = vpop.permute.xlu1 %455 }
 0x71f   :  { %1191 = vmatpush3.msra.mxu0 %v456_v3 }
 0x720   :  { %1247 = vmatprep.subr.bf16.mxu0 %v1318_v27 }
 0x725   :  { %v1283_v4 = vpop.eup %1282 }
 0x726   :  { %v454_v5 = vmul.f32 %v1283_v4, %v1281_v0 }
 0x728   :  { %1193 = vmatmul.mubr.msk.f32.vlgmr.msra.gmra.mrb[2].mxu0 %vm202_vm4, %v454_v5  ;;  %v768_v6 = vpop.f32.mrb[10].mxu1 }
 0x729   :  { %v1211_v7 = vpop.f32.mrb[11].mxu1  ;;  %1199 = vmatprep.mubr.msk.f32.mxu0 %vm1313_vm1, %v1312_v8  ;;  %1249 = vmatpush3.bf16.msra.mxu0 %v1248_v19 }
 0x72a   :  { %1250 = vmatprep.subr.bf16.mxu0 %v1318_v27 }
 0x72c   :  { %v920_v11 = vpop.f32.mrb[12].mxu1 }
 0x72d   :  { %v924_v12 = vmul.f32 0.17677669, %v920_v11  ;;  %v1223_v15 = vpop.f32.mrb[13].mxu1 }
 0x72f   :  { %v925_v10 = vsel %vm115_vm3, %v924_v12, -1e+30 }
 0x730   :  { %v926_v16 = vsel %vm202_vm4, %v925_v10, -inf }
 0x731   :  { %927 = vmax.xlane.f32.xlu1 %v926_v16 }
 0x7be   :  { %v928_v20 = vpop.xlane.xlu1 %927 }
 0x7bf   :  { %v929_v21 = vsub.f32 %v925_v10, %v928_v20 }
 0x7c1   :  { %v930_v22 = vmul.f32 1.442695, %v929_v21 }
 0x7c3   :  { %1284 = vpow2.f32 %v930_v22 }
 0x7cd   :  { %v1285_v13 = vpop.eup %1284 }
 0x7ce   :  { %v932_v14 = vsel %vm202_vm4, %v1285_v13, 0.0 }
 0x7cf   :  { %933 = vadd.xlane.f32.xlu0 %v932_v14 }
 0x7e5   :  { %937 = vrot.lane.b32.xlu0 %v1374_v9, %s1319_s7 }
 0x7fb   :  { %v527_v23 = vpop.f32.mrb[2].mxu0 }
 0x7fc   :  { %v1194_v24 = vpop.f32.mrb[3].mxu0  ;;  %1200 = vmatmul.mubr.msk.f32.vlgmr.msra.gmra.mrb[4].mxu0 %vm125_vm2, %v527_v23 }
 0x7fd   :  { %1252 = vmatpush3.bf16.msra.mxu0 %v1412_v31  ;;  %1216 = vmatprep.mubr.msk.f32.mxu0 %vm1313_vm1, %v1312_v8 }
 0x7fe   :  { %1224 = vmatprep.subr.mxu0 %v1312_v8 }
 0x800   :  { %1217 = vmatmul.mubr.msk.f32.vlgmr.msra.gmra.mrb[6].mxu0 %vm125_vm2, %v768_v6 }
 0x801   :  { %1226 = vmatprep.mubr.msk.f32.mxu0 %vm1313_vm1, %v1312_v8 }
 0x85c   :  { %v934_v25 = vpop.xlane.xlu0 %933 }
 0x85d   :  { %1286 = vrcp.f32 %v934_v25 }
 0x860   :  { %v938_v26 = vpop.permute.xlu0 %937 }
 0x861   :  { %1225 = vmatpush3.msra.mxu0 %v938_v26 }
 0x862   :  { %1253 = vmatprep.subr.bf16.mxu0 %v1318_v27 }
 0x867   :  { %v1287_v9 = vpop.eup %1286 }
 0x868   :  { %v936_v28 = vmul.f32 %v1287_v9, %v1285_v13 }
 0x86a   :  { %1227 = vmatmul.mubr.msk.f32.vlgmr.msra.gmra.mrb[8].mxu0 %vm202_vm4, %v936_v28 }
 0x86b   :  { %1255 = vmatpush3.bf16.msra.mxu0 %v1248_v19  ;;  %1233 = vmatprep.mubr.msk.f32.mxu0 %vm1313_vm1, %v1312_v8 }
 0x8cf   :  { %v600_v31 = vpop.f32.mrb[4].mxu0 }
 0x8d0   :  { %v604_v32 = vadd.f32 %v600_v31, %v363_v30  ;;  %v1201_v33 = vpop.f32.mrb[5].mxu0 }
 0x8d2   :  { %605 = vst.msk [vmem:[#allocation2] sm:$0xff] %vm24_vm0, %v604_v32 }
 0x93d   :  { %v1009_v27 = vpop.f32.mrb[8].mxu0 }
 0x93e   :  { %v1228_v34 = vpop.f32.mrb[9].mxu0  ;;  %1234 = vmatmul.mubr.msk.f32.vlgmr.msra.gmra.mrb[6].mxu0 %vm125_vm2, %v1009_v27 }
 0xa11   :  { %v1082_v35 = vpop.f32.mrb[6].mxu0 }
 0xa12   :  { %v1258_v36 = vadd.f32 %v1106_v29, %v1082_v35  ;;  %v1235_v8 = vpop.f32.mrb[7].mxu0 }
 0xa14   :  { %1087 = vst.msk [vmem:[#allocation2 + $0x8] sm:$0xff] %vm24_vm0, %v1258_v36 }
 0xa15   :  { %1299 = shalt.err (!%p1296_p4)
}
 0xa16   :  { %s1300_s17 = scalar_lea.hbm %s1508_s4, 256 }
 0xa17   :  { %p1301_p5 = scmp.ne.s32.totalorder %s1508_s4, %s1300_s17  ;;  %p1304_p6 = scmp.lt.u32.totalorder %s1300_s17, %s1508_s4 }
 0xa19   :  { %p1306_p7 = pnand %p1304_p6, %p1301_p5 }
 0xa1b   :  { %1309 = shalt.err (!%p1306_p7)
}
 0xa1c   :  { %s1321_s22 = smov 128   ;;  %s1322_s23 = smov 8  }
 0xa1d   :  { %1099 = dma.vmem_to_hbm [thread:$0]  %s1094_s14, 256, %s1508_s4, [#allocation3], %s1321_s22, %s1321_s22, %s1322_s23  }
 0xa1e   :  { %1310 = dma.done.wait [#allocation3], 256  }
 0xa1f   :  { %1311 = vsyncadd [#allocation3], 4294967040 }
 0xa20   :  { %1103 = vsyncpa [#allocation3], 1 }

</bundles_post_ra>
